<compile_context>
chip_gen: v7x
topology: tpu7x:2x2x1
jax: 0.10.0
libtpu: 0.0.40
codegen_flags: <defaults>
</compile_context>

<pallas_src>
import numpy as np
import jax
import jax.numpy as jnp
from jax import lax
from jax.experimental import pallas as pl
from jax.experimental.pallas import tpu as pltpu


def _spatial_softmax_kernel(inv_temperature):
    # Plain Python float: inlined as a literal (jnp.float32(...) here made
    # Pallas reject the kernel for capturing a traced constant).
    inv_t = float(inv_temperature)

    def kernel(feat_ref, posw_ref, out_ref):
        # feat_ref: (TR, HW) native dtype
        # posw_ref: (HW, 3)  f32, columns = [pos_x, pos_y, ones]
        # out_ref : (TR, 2)  f32, columns = [expected_x, expected_y]
        feat = feat_ref[...]
        # Row max on the native dtype (max is exact in bf16); cast only inside
        # the exp argument -- no full f32 copy of the block is materialized.
        m = jnp.max(feat, axis=-1, keepdims=True).astype(jnp.float32)
        # softmax(x / T) numerator; the 1/T divide is folded into the exp arg
        # (max(x/T) == max(x)/T for T > 0).
        p = jnp.exp((feat.astype(jnp.float32) - m) * inv_t)          # (TR, HW)
        # One MXU dot replaces three VALU-multiply + XLU lane-reduce passes:
        #   r[:, 0] = sum(pos_x * p), r[:, 1] = sum(pos_y * p), r[:, 2] = sum(p)
        r = jnp.dot(p, posw_ref[...],
                    preferred_element_type=jnp.float32,
                    precision=lax.Precision.HIGHEST)                 # (TR, 3)
        inv = pl.reciprocal(r[:, 2:3], approx=False)  # exact: 1e-5 parity
        out_ref[...] = r[:, 0:2] * inv

    return kernel


def _target_block_bytes():
    """Per-block feature-map byte budget (native dtype).

    Bigger blocks amortize the ~0.35 us fixed grid-step cost on high-bandwidth
    chips; keep it modest enough that double-buffered inputs + the f32 softmax
    block fit comfortably under v7x's 64 MiB physical VMEM."""
    try:
        cap = getattr(pltpu.get_tpu_info(), "vmem_capacity_bytes", None)
    except Exception:
        cap = None
    if cap is not None and cap >= (96 << 20):   # v5e / v6e class (128 MiB VMEM)
        return 8 << 20
    return 6 << 20                              # v7x (64 MiB) / unknown


def _choose_row_tile(R, HW, itemsize, target_block_bytes, max_tile=16384):
    """Rows per block: large enough to amortize the per-step overhead, small
    enough that double-buffered inputs + the f32 temporaries fit in VMEM, and
    split so the 'parallel' grid axis has an even number (>= 2) of steps when
    there is enough work (v7x has two TensorCores)."""
    r_up = -(-R // 8) * 8                       # R rounded up to sublane multiple
    rows = max(8, target_block_bytes // (HW * itemsize))
    tile = int(min(rows, max_tile, max(r_up, 8)))
    tile = max(8, tile - tile % 8)
    steps = -(-r_up // tile)
    if r_up >= 32:                              # enough rows to split
        if steps < 2:
            steps = 2
        elif steps % 2 == 1 and steps <= 16:
            steps += 1
        rows_per = -(-r_up // steps)
        tile = -(-rows_per // 8) * 8
    if itemsize < 4 and tile >= 16:
        tile = -(-tile // 16) * 16              # bf16 (16, 128) sublane packing
    return max(8, int(tile))


def _vmem_limit_bytes(row_tile, HW, itemsize):
    feat_block = row_tile * HW * itemsize       # one input buffer
    p_block = row_tile * HW * 4                 # f32 softmax numerator
    # double-buffered input + f32 block + compiler-scratch headroom,
    # capped well under v7x's 64 MiB physical VMEM (v5e/v6e have 128 MiB).
    limit = 2 * feat_block + p_block + (6 << 20)
    return int(min(max(limit, 16 << 20), 48 << 20))


def spatial_softmax(feature_nchw, pos_x, pos_y, temperature=1.0, row_tile=None):
    """feature_nchw: (N, C, H, W) -> (N, C*2) float32 (expected x/y per channel)."""
    N, C, H, W = feature_nchw.shape
    HW = H * W
    R = N * C

    feat = feature_nchw.reshape(R, HW)          # native dtype, no cast, no pad
    # Single (HW, 3) operand [pos_x, pos_y, 1]: the kernel reduces all three
    # weighted sums with one MXU dot.
    posw = jnp.stack(
        [pos_x.reshape(HW).astype(jnp.float32),
         pos_y.reshape(HW).astype(jnp.float32),
         jnp.ones((HW,), jnp.float32)],
        axis=1)

    itemsize = int(jnp.dtype(feature_nchw.dtype).itemsize)
    if row_tile is None:
        row_tile = _choose_row_tile(R, HW, itemsize, _target_block_bytes())
    grid = (pl.cdiv(R, row_tile),)

    # NOTE: for very large H*W (a single 8-row block no longer fits the VMEM
    # budget) this would need a second 'arbitrary' grid axis over HW with an
    # online-softmax accumulator; not required for these feature-map sizes.

    cost = pl.CostEstimate(
        flops=int(8 * R * HW),                 # sub + mul + (HW,3) MACs
        transcendentals=int(R * HW),           # one exp per element
        bytes_accessed=int(R * HW * itemsize + HW * 3 * 4 + R * 2 * 4),
    )

    # TODO(synk): if `temperature` is a learned Parameter (traced scalar), pass
    # it as an SMEM scalar input instead of folding a static Python float.
    out = pl.pallas_call(
        _spatial_softmax_kernel(1.0 / float(temperature)),
        out_shape=jax.ShapeDtypeStruct((R, 2), jnp.float32),
        grid_spec=pltpu.PrefetchScalarGridSpec(
            num_scalar_prefetch=0,
            grid=grid,
            in_specs=[
                pl.BlockSpec((row_tile, HW), lambda i: (i, 0)),
                pl.BlockSpec((HW, 3), lambda i: (0, 0)),
            ],
            out_specs=pl.BlockSpec((row_tile, 2), lambda i: (i, 0)),
        ),
        compiler_params=pltpu.CompilerParams(
            dimension_semantics=("parallel",),
            vmem_limit_bytes=_vmem_limit_bytes(row_tile, HW, itemsize),
        ),
        cost_estimate=cost,
    )(feat, posw)

    return out.reshape(N, C * 2)     # interleaves [x0, y0, x1, y1, ...]


def make_pos_buffers(height, width):
    # Reproduce the torch module exactly (incl. the meshgrid 'xy' indexing quirk).
    pos_x, pos_y = np.meshgrid(np.linspace(-1.0, 1.0, height),
                               np.linspace(-1.0, 1.0, width))
    pos_x = pos_x.reshape(height * width).astype(np.float32)
    pos_y = pos_y.reshape(height * width).astype(np.float32)
    return jnp.asarray(pos_x), jnp.asarray(pos_y)


def reference_spatial_softmax(feature_nchw, pos_x, pos_y, temperature=1.0):
    N, C, H, W = feature_nchw.shape
    feat = feature_nchw.reshape(-1, H * W).astype(jnp.float32) / temperature
    attn = jax.nn.softmax(feat, axis=-1)
    ex = jnp.sum(pos_x[None, :] * attn, axis=1, keepdims=True)
    ey = jnp.sum(pos_y[None, :] * attn, axis=1, keepdims=True)
    return jnp.concatenate([ex, ey], axis=1).reshape(N, C * 2)


if __name__ == "__main__":
    key = jax.random.PRNGKey(0)
    k1, k2, k3 = jax.random.split(key, 3)

    # Case 1: module-default shapes / temperature (temperature=None -> 1.0).
    N, C, H, W = 2, 4, 16, 16
    feature = jax.random.normal(k1, (N, C, H, W), dtype=jnp.float32)
    pos_x, pos_y = make_pos_buffers(H, W)
    out = jax.block_until_ready(spatial_softmax(feature, pos_x, pos_y, 1.0))
    ref = reference_spatial_softmax(feature, pos_x, pos_y, 1.0)
    assert out.shape == (N, C * 2), out.shape
    np.testing.assert_allclose(np.asarray(out), np.asarray(ref), rtol=1e-5, atol=1e-5)

    # Case 2: multiple grid steps + a partial tail block, non-unit temperature
    # folded into the exp argument.
    N2, C2, H2, W2 = 3, 24, 12, 12
    feature2 = jax.random.normal(k2, (N2, C2, H2, W2), dtype=jnp.float32)
    pos_x2, pos_y2 = make_pos_buffers(H2, W2)
    out2 = jax.block_until_ready(
        spatial_softmax(feature2, pos_x2, pos_y2, temperature=2.0))
    ref2 = reference_spatial_softmax(feature2, pos_x2, pos_y2, temperature=2.0)
    assert out2.shape == (N2, C2 * 2), out2.shape
    np.testing.assert_allclose(np.asarray(out2), np.asarray(ref2), rtol=1e-5, atol=1e-5)

    # Case 3: bf16 input (native-dtype max path) and a non-square feature map.
    N3, C3, H3, W3 = 4, 8, 10, 14
    feature3 = jax.random.normal(k3, (N3, C3, H3, W3), dtype=jnp.float32
                                 ).astype(jnp.bfloat16)
    pos_x3, pos_y3 = make_pos_buffers(H3, W3)
    out3 = jax.block_until_ready(
        spatial_softmax(feature3, pos_x3, pos_y3, temperature=1.0))
    ref3 = reference_spatial_softmax(feature3, pos_x3, pos_y3, temperature=1.0)
    assert out3.shape == (N3, C3 * 2), out3.shape
    np.testing.assert_allclose(np.asarray(out3), np.asarray(ref3), rtol=1e-4, atol=1e-4)

    print("KERNEL_OK")
</pallas_src>

<mosaic_0001>
module attributes {stable_mosaic.version = 11 : i64} {
  func.func @kernel(%arg0: i32, %arg1: memref<8x256xf32, #tpu.memory_space<vmem>>, %arg2: memref<256x3xf32, #tpu.memory_space<vmem>>, %arg3: memref<8x2xf32, #tpu.memory_space<vmem>>) attributes {dimension_semantics = [#tpu.dimension_semantics<parallel>], iteration_bounds = array<i64: 1>, scalar_prefetch = 0 : i64, scratch_operands = 0 : i64, tpu.core_type = #tpu.core_type<tc>, window_params = [{transform_indices = @transform_0, window_bounds = array<i64: 8, 256>}, {pipeline_mode = #tpu.pipeline_mode<synchronous>, transform_indices = @transform_1, window_bounds = array<i64: 256, 3>}, {transform_indices = @transform_2, window_bounds = array<i64: 8, 2>}]} {
    %c0 = arith.constant 0 : index
    %c0_0 = arith.constant 0 : index
    %0 = vector.load %arg1[%c0, %c0_0] : memref<8x256xf32, #tpu.memory_space<vmem>>, vector<8x256xf32>
    %cst = arith.constant dense<0xFF800000> : vector<8xf32>
    %1 = vector.multi_reduction <maximumf>, %0, %cst [1] : vector<8x256xf32> to vector<8xf32>
    %2 = vector.shape_cast %1 : vector<8xf32> to vector<8x1xf32>
    %3 = vector.broadcast %2 : vector<8x1xf32> to vector<8x256xf32>
    %4 = arith.subf %0, %3 : vector<8x256xf32>
    %cst_1 = arith.constant 1.000000e+00 : f32
    %5 = vector.broadcast %cst_1 : f32 to vector<8x256xf32>
    %6 = arith.mulf %4, %5 : vector<8x256xf32>
    %7 = math.exp %6 : vector<8x256xf32>
    %c0_2 = arith.constant 0 : index
    %c0_3 = arith.constant 0 : index
    %8 = vector.load %arg2[%c0_2, %c0_3] : memref<256x3xf32, #tpu.memory_space<vmem>>, vector<256x3xf32>
    %cst_4 = arith.constant dense<0.000000e+00> : vector<8x3xf32>
    %9 = tpu.matmul %7, %8, %cst_4 {dimension_numbers = #tpu.dot_dimension_numbers<[1], [0], [0], [1], [0, 0, 1, 1], [], []>, precision = #tpu.contract_precision<fp32>} : vector<8x256xf32>, vector<256x3xf32>, vector<8x3xf32> -> vector<8x3xf32>
    %10 = vector.extract_strided_slice %9 {offsets = [0, 2], sizes = [8, 1], strides = [1, 1]} : vector<8x3xf32> to vector<8x1xf32>
    %11 = tpu.reciprocal %10 : vector<8x1xf32> -> vector<8x1xf32>
    %12 = vector.extract_strided_slice %9 {offsets = [0, 0], sizes = [8, 2], strides = [1, 1]} : vector<8x3xf32> to vector<8x2xf32>
    %13 = vector.broadcast %11 : vector<8x1xf32> to vector<8x2xf32>
    %14 = arith.mulf %12, %13 : vector<8x2xf32>
    %c0_5 = arith.constant 0 : index
    %c0_6 = arith.constant 0 : index
    %15 = vector.load %arg3[%c0_5, %c0_6] : memref<8x2xf32, #tpu.memory_space<vmem>>, vector<8x2xf32>
    tpu.vector_store %arg3[%c0_5, %c0_6], %14 {strides = array<i32>} : memref<8x2xf32, #tpu.memory_space<vmem>>, vector<8x2xf32>,
    return
  }
  func.func @transform_0(%arg0: i32) -> (i32, i32) {
    %c0_i32 = arith.constant 0 : i32
    %c0_i32_0 = arith.constant 0 : i32
    return %arg0, %c0_i32 : i32, i32
  }
  func.func @transform_1(%arg0: i32) -> (i32, i32) {
    %c0_i32 = arith.constant 0 : i32
    %c0_i32_0 = arith.constant 0 : i32
    %c0_i32_1 = arith.constant 0 : i32
    return %c0_i32, %c0_i32_0 : i32, i32
  }
  func.func @transform_2(%arg0: i32) -> (i32, i32) {
    %c0_i32 = arith.constant 0 : i32
    %c0_i32_0 = arith.constant 0 : i32
    return %arg0, %c0_i32 : i32, i32
  }
}

</mosaic_0001>

<bundles_post_ra>
// kernel: tpu_custom_call.1
= control target key start
LH: loop header
LB: loop body
LE: loop exit
PB: predicated region body
PF: predicated region fallthrough
CT: control target
= control target key end

     0   :  { %vm923_vm0 = vcmask 15360   ;;  %s1979_s0 = inlined_call_operand.vmem [shape: f32[8,256], index: 0, kind: input, shape index: {}]   ;;  %s1980_s1 = inlined_call_operand.vmem [shape: f32[256,3], index: 1, kind: input, shape index: {}]   ;;  %s1981_s2 = inlined_call_operand.vmem [shape: f32[8,2], index: 2, kind: output, shape index: {}]  }
   0x1   :  { %v1358_v0 = vld [vmem:[%s1979_s0] sm:$0xff]  ;;  %v1363_v1 = vld [vmem:[%s1979_s0 + $0x8] sm:$0xff]  ;;  %v40_v11 = vld [vmem:[%s1980_s1 + $0x90] sm:$0xff] }
   0x2   :  { %v38_v2 = vld [vmem:[%s1980_s1 + $0x80] sm:$0xff]  ;;  %v13_v3 = vmax.f32 %v1358_v0, %v1363_v1  ;;  %v39_v4 = vld [vmem:[%s1980_s1 + $0x88] sm:$0xff]  ;;  %v41_v12 = vld [vmem:[%s1980_s1 + $0x98] sm:$0xff]  ;;  %v109_v15 = vand.u32 4294901760, %v40_v11 }
   0x3   :  { %v103_v5 = vand.u32 4294901760, %v38_v2  ;;  %v22_v6 = vld [vmem:[%s1980_s1] sm:$0xff]  ;;  %v23_v7 = vld [vmem:[%s1980_s1 + $0x8] sm:$0xff]  ;;  %v106_v8 = vand.u32 4294901760, %v39_v4  ;;  %v1388_v13 = vld [vmem:[%s1980_s1 + $0x10] sm:$0xff]  ;;  %v112_v16 = vand.u32 4294901760, %v41_v12 }
   0x4   :  { %v55_v9 = vand.u32 4294901760, %v22_v6  ;;  %v58_v10 = vand.u32 4294901760, %v23_v7  ;;  %14 = vmax.xlane.f32.xlu0 %v13_v3  ;;  %v1395_v17 = vld [vmem:[%s1980_s1 + $0x18] sm:$0xff]  ;;  %v61_v18 = vand.u32 4294901760, %v1388_v13  ;;  %v1406_v24 = vsub.f32 %v40_v11, %v109_v15  ;;  %v1449_v43 = vld [vmem:[%s1980_s1 + $0xa0] sm:$0xff]  ;;  %v1457_v48 = vld [vmem:[%s1980_s1 + $0xa8] sm:$0xff] }
   0x5   :  { %v1390_v14 = vsub.f32 %v38_v2, %v103_v5  ;;  %v1398_v19 = vsub.f32 %v39_v4, %v106_v8  ;;  %v64_v22 = vand.u32 4294901760, %v1395_v17  ;;  %v1408_v25 = vsub.f32 %v41_v12, %v112_v16  ;;  %v1462_v49 = vld [vmem:[%s1980_s1 + $0x20] sm:$0xff]  ;;  %v1469_v54 = vld [vmem:[%s1980_s1 + $0x28] sm:$0xff]  ;;  %v1475_v59 = vld [vmem:[%s1980_s1 + $0xb0] sm:$0xff] }
   0x6   :  { %v1400_v20 = vsub.f32 %v22_v6, %v55_v9  ;;  %v1402_v21 = vsub.f32 %v23_v7, %v58_v10  ;;  %v1413_v26 = vsub.f32 %v1388_v13, %v61_v18  ;;  %v1989_v32 = vand.u32 4294901760, %v1406_v24  ;;  %v1480_v60 = vld [vmem:[%s1980_s1 + $0xb8] sm:$0xff]  ;;  %v1490_v3 = vld [vmem:[%s1980_s1 + $0x30] sm:$0xff] }
   0x7   :  { %v1993_v23 = vand.u32 4294901760, %v1390_v14  ;;  %v1992_v27 = vand.u32 4294901760, %v1398_v19  ;;  %v1419_v30 = vsub.f32 %v1395_v17, %v64_v22  ;;  %v1988_v33 = vand.u32 4294901760, %v1408_v25  ;;  %v1512_v12 = vld [vmem:[%s1980_s1 + $0x38] sm:$0xff] }
   0x8   :  { %v1991_v28 = vand.u32 4294901760, %v1400_v20  ;;  %v1990_v29 = vand.u32 4294901760, %v1402_v21  ;;  %v1987_v34 = vand.u32 4294901760, %v1413_v26  ;;  %v296_v40 = vsub.f32 %v1406_v24, %v1989_v32  ;;  %v1680_v32 = vld [vmem:[%s1980_s1 + $0xe0] sm:$0xff] }
   0x9   :  { %v282_v31 = vsub.f32 %v1390_v14, %v1993_v23  ;;  %v289_v35 = vsub.f32 %v1398_v19, %v1992_v27  ;;  %v1986_v38 = vand.u32 4294901760, %v1419_v30  ;;  %v303_v41 = vsub.f32 %v1408_v25, %v1988_v33 }
   0xa   :  { %v170_v36 = vsub.f32 %v1400_v20, %v1991_v28  ;;  %v177_v37 = vsub.f32 %v1402_v21, %v1990_v29  ;;  %v184_v42 = vsub.f32 %v1413_v26, %v1987_v34  ;;  %v297_v50 = vand.u32 4294901760, %v296_v40  ;;  %v1685_v29 = vld [vmem:[%s1980_s1 + $0xe8] sm:$0xff] }
   0xb   :  { %v283_v39 = vand.u32 4294901760, %v282_v31  ;;  %v290_v44 = vand.u32 4294901760, %v289_v35  ;;  %v191_v47 = vsub.f32 %v1419_v30, %v1986_v38  ;;  %v304_v51 = vand.u32 4294901760, %v303_v41 }
   0xc   :  { %v171_v45 = vand.u32 4294901760, %v170_v36  ;;  %v178_v46 = vand.u32 4294901760, %v177_v37  ;;  %v185_v52 = vand.u32 4294901760, %v184_v42  ;;  %v1464_v53 = vpack.c.bf16 %v106_v8, %v103_v5 }
   0xd   :  { %v1171_v55 = vpack.c.bf16 %v290_v44, %v283_v39  ;;  %v192_v57 = vand.u32 4294901760, %v191_v47  ;;  %v115_v58 = vand.u32 4294901760, %v1449_v43  ;;  %v1175_v61 = vpack.c.bf16 %v304_v51, %v297_v50  ;;  %v1561_v50 = vld [vmem:[%s1980_s1 + $0xc0] sm:$0xff] }
   0xe   :  { %v1173_v56 = vpack.c.bf16 %v178_v46, %v171_v45  ;;  %1140 = vmatprep.subr.bf16.mxu0 %v1464_v53  ;;  %v118_v62 = vand.u32 4294901760, %v1457_v48  ;;  %v1484_v63 = vpack.c.bf16 %v58_v10, %v55_v9  ;;  %v67_v2 = vand.u32 4294901760, %v1462_v49 }
   0xf   :  { %1172 = vmatprep.subr.bf16.mxu1 %v1171_v55  ;;  %v1177_v4 = vpack.c.bf16 %v192_v57, %v185_v52  ;;  %v1493_v5 = vsub.f32 %v1449_v43, %v115_v58  ;;  %v70_v6 = vand.u32 4294901760, %v1469_v54  ;;  %v1496_v7 = vpack.c.bf16 %v112_v16, %v109_v15 }
  0x10   :  { %1174 = vmatpush3.bf16.msra.mxu1 %v1173_v56  ;;  %v1499_v8 = vsub.f32 %v1457_v48, %v118_v62  ;;  %1142 = vmatpush3.bf16.msra.mxu0 %v1484_v63  ;;  %v1505_v9 = vsub.f32 %v1462_v49, %v67_v2  ;;  %v121_v10 = vand.u32 4294901760, %v1475_v59  ;;  %v124_v11 = vand.u32 4294901760, %v1480_v60  ;;  %v1572_v56 = vld [vmem:[%s1980_s1 + $0xc8] sm:$0xff] }
  0x11   :  { %1176 = vmatprep.subr.bf16.mxu1 %v1175_v61  ;;  %v2005_v15 = vand.u32 4294901760, %v1493_v5  ;;  %v1516_v16 = vsub.f32 %v1469_v54, %v70_v6  ;;  %1144 = vmatprep.subr.bf16.mxu0 %v1496_v7  ;;  %v1521_v17 = vpack.c.bf16 %v64_v22, %v61_v18  ;;  %v73_v31 = vand.u32 4294901760, %v1490_v3 }
  0x12   :  { %v2004_v35 = vand.u32 4294901760, %v1499_v8  ;;  %v2003_v36 = vand.u32 4294901760, %v1505_v9  ;;  %v1527_v37 = vsub.f32 %v1475_v59, %v121_v10  ;;  %v1530_v39 = vsub.f32 %v1480_v60, %v124_v11 }
  0x13   :  { %v310_v40 = vsub.f32 %v1493_v5, %v2005_v15  ;;  %v2000_v13 = vand.u32 4294901760, %v1516_v16  ;;  %v76_v18 = vand.u32 4294901760, %v1512_v12  ;;  %v1540_v22 = vsub.f32 %v1490_v3, %v73_v31 }
  0x14   :  { %1178 = vmatpush3.bf16.msra.mxu1 %v1177_v4  ;;  %v317_v41 = vsub.f32 %v1499_v8, %v2004_v35  ;;  %v198_v42 = vsub.f32 %v1505_v9, %v2003_v36  ;;  %v1985_v43 = vand.u32 4294901760, %v1527_v37  ;;  %v1983_v44 = vand.u32 4294901760, %v1530_v39  ;;  %1146 = vmatpush3.bf16.msra.mxu0 %v1521_v17  ;;  %v1583_v4 = vld [vmem:[%s1980_s1 + $0x40] sm:$0xff] }
  0x15   :  { %v311_v45 = vand.u32 4294901760, %v310_v40  ;;  %v205_v46 = vsub.f32 %v1516_v16, %v2000_v13  ;;  %v1982_v47 = vand.u32 4294901760, %v1540_v22  ;;  %v1556_v48 = vsub.f32 %v1512_v12, %v76_v18 }
  0x16   :  { %v318_v51 = vand.u32 4294901760, %v317_v41  ;;  %v199_v52 = vand.u32 4294901760, %v198_v42  ;;  %v324_v54 = vsub.f32 %v1527_v37, %v1985_v43  ;;  %v331_v55 = vsub.f32 %v1530_v39, %v1983_v44 }
  0x17   :  { %v206_v57 = vand.u32 4294901760, %v205_v46  ;;  %v212_v59 = vsub.f32 %v1540_v22, %v1982_v47  ;;  %v1984_v60 = vand.u32 4294901760, %v1556_v48  ;;  %v1578_v61 = vpack.c.bf16 %v118_v62, %v115_v58  ;;  %v1589_v46 = vld [vmem:[%s1980_s1 + $0x48] sm:$0xff] }
  0x18   :  { %v1179_v12 = vpack.c.bf16 %v318_v51, %v311_v45  ;;  %v325_v40 = vand.u32 4294901760, %v324_v54  ;;  %v332_v41 = vand.u32 4294901760, %v331_v55  ;;  %v127_v42 = vand.u32 4294901760, %v1561_v50  ;;  %v1599_v45 = vld [vmem:[%s1980_s1 + $0xd0] sm:$0xff]  ;;  %v1604_v51 = vld [vmem:[%s1980_s1 + $0xd8] sm:$0xff] }
  0x19   :  { %v1181_v47 = vpack.c.bf16 %v206_v57, %v199_v52  ;;  %v213_v44 = vand.u32 4294901760, %v212_v59  ;;  %v219_v58 = vsub.f32 %v1556_v48, %v1984_v60  ;;  %1148 = vmatprep.subr.bf16.mxu0 %v1578_v61  ;;  %v130_v62 = vand.u32 4294901760, %v1572_v56 }
  0x1a   :  { %1180 = vmatprep.subr.bf16.mxu1 %v1179_v12  ;;  %v1183_v52 = vpack.c.bf16 %v332_v41, %v325_v40  ;;  %v1607_v54 = vsub.f32 %v1561_v50, %v127_v42  ;;  %v1611_v55 = vpack.c.bf16 %v70_v6, %v67_v2  ;;  %v79_v57 = vand.u32 4294901760, %v1583_v4 }
  0x1b   :  { %1182 = vmatpush3.bf16.msra.mxu1 %v1181_v47  ;;  %v220_v59 = vand.u32 4294901760, %v219_v58  ;;  %v1615_v60 = vsub.f32 %v1572_v56, %v130_v62  ;;  %v82_v43 = vand.u32 4294901760, %v1589_v46  ;;  %v1618_v38 = vpack.c.bf16 %v124_v11, %v121_v10  ;;  %v1630_v47 = vld [vmem:[%s1980_s1 + $0x50] sm:$0xff]  ;;  %v1635_v10 = vld [vmem:[%s1980_s1 + $0x58] sm:$0xff] }
  0x1c   :  { %2024 = vst [vmem:[#allocation2_spill] sm:$0xff] %v1611_v55  ;;  %1184 = vmatprep.subr.bf16.mxu1 %v1183_v52  ;;  %v1997_v12 = vand.u32 4294901760, %v1607_v54  ;;  %1150 = vmatpush3.bf16.msra.mxu0 %v1611_v55  ;;  %v1623_v49 = vsub.f32 %v1583_v4, %v79_v57  ;;  %v133_v2 = vand.u32 4294901760, %v1599_v45  ;;  %v136_v6 = vand.u32 4294901760, %v1604_v51 }
  0x1d   :  { %2025 = vst [vmem:[#allocation3_spill] sm:$0xff] %v1618_v38  ;;  %v1185_v11 = vpack.c.bf16 %v220_v59, %v213_v44  ;;  %v1996_v50 = vand.u32 4294901760, %v1615_v60  ;;  %v1639_v56 = vsub.f32 %v1589_v46, %v82_v43  ;;  %1152 = vmatprep.subr.bf16.mxu0 %v1618_v38  ;;  %v1644_v4 = vpack.c.bf16 %v76_v18, %v73_v31 }
  0x1e   :  { %v338_v40 = vsub.f32 %v1607_v54, %v1997_v12  ;;  %v1995_v41 = vand.u32 4294901760, %v1623_v49  ;;  %v1651_v58 = vsub.f32 %v1599_v45, %v133_v2  ;;  %v1654_v44 = vsub.f32 %v1604_v51, %v136_v6 }
  0x1f   :  { %2026 = vst [vmem:[#allocation4_spill] sm:$0xff] %v1644_v4  ;;  %1186 = vmatpush3.bf16.msra.mxu1 %v1185_v11  ;;  %v345_v46 = vsub.f32 %v1615_v60, %v1996_v50  ;;  %v1994_v3 = vand.u32 4294901760, %v1639_v56  ;;  %v85_v31 = vand.u32 4294901760, %v1630_v47  ;;  %v88_v18 = vand.u32 4294901760, %v1635_v10 }
  0x20   :  { %v339_v52 = vand.u32 4294901760, %v338_v40  ;;  %v226_v45 = vsub.f32 %v1623_v49, %v1995_v41  ;;  %v1998_v59 = vand.u32 4294901760, %v1651_v58  ;;  %v1999_v51 = vand.u32 4294901760, %v1654_v44  ;;  %1154 = vmatpush3.bf16.msra.mxu0 %v1644_v4 }
  0x21   :  { %v346_v11 = vand.u32 4294901760, %v345_v46  ;;  %v233_v34 = vsub.f32 %v1639_v56, %v1994_v3  ;;  %v1672_v33 = vsub.f32 %v1630_v47, %v85_v31  ;;  %v1675_v40 = vsub.f32 %v1635_v10, %v88_v18 }
  0x22   :  { %v227_v46 = vand.u32 4294901760, %v226_v45  ;;  %v352_v28 = vsub.f32 %v1651_v58, %v1998_v59  ;;  %v359_v47 = vsub.f32 %v1654_v44, %v1999_v51  ;;  %v1693_v10 = vpack.c.bf16 %v130_v62, %v127_v42  ;;  %v1700_v45 = vld [vmem:[%s1980_s1 + $0x60] sm:$0xff] }
  0x23   :  { %v1187_v27 = vpack.c.bf16 %v346_v11, %v339_v52  ;;  %v234_v23 = vand.u32 4294901760, %v233_v34  ;;  %v2002_v3 = vand.u32 4294901760, %v1672_v33  ;;  %v2001_v41 = vand.u32 4294901760, %v1675_v40  ;;  %v35_v34 = vld [vmem:[%s1980_s1 + $0x68] sm:$0xff] }
  0x24   :  { %2027 = vst [vmem:[#allocation5_spill] sm:$0xff] %v1693_v10  ;;  %v353_v50 = vand.u32 4294901760, %v352_v28  ;;  %v360_v12 = vand.u32 4294901760, %v359_v47  ;;  %1156 = vmatprep.subr.bf16.mxu0 %v1693_v10  ;;  %v139_v59 = vand.u32 4294901760, %v1680_v32  ;;  %v142_v42 = vand.u32 4294901760, %v1685_v29  ;;  %v52_v47 = vld [vmem:[%s1980_s1 + $0xf0] sm:$0xff] }
  0x25   :  { %1188 = vmatprep.subr.bf16.mxu1 %v1187_v27  ;;  %v1189_v62 = vpack.c.bf16 %v234_v23, %v227_v46  ;;  %v240_v52 = vsub.f32 %v1672_v33, %v2002_v3  ;;  %v247_v28 = vsub.f32 %v1675_v40, %v2001_v41  ;;  %v1714_v11 = vpack.c.bf16 %v82_v43, %v79_v57  ;;  %v53_v46 = vld [vmem:[%s1980_s1 + $0xf8] sm:$0xff] }
  0x26   :  { %v1191_v51 = vpack.c.bf16 %v360_v12, %v353_v50  ;;  %v1720_v13 = vsub.f32 %v1680_v32, %v139_v59  ;;  %v1723_v23 = vsub.f32 %v1685_v29, %v142_v42  ;;  %v91_v27 = vand.u32 4294901760, %v1700_v45 }
  0x27   :  { %2028 = vst [vmem:[#allocation6_spill] sm:$0xff] %v1714_v11  ;;  %1190 = vmatpush3.bf16.msra.mxu1 %v1189_v62  ;;  %v241_v43 = vand.u32 4294901760, %v240_v52  ;;  %v248_v57 = vand.u32 4294901760, %v247_v28  ;;  %1158 = vmatpush3.bf16.msra.mxu0 %v1714_v11  ;;  %v94_v41 = vand.u32 4294901760, %v35_v34  ;;  %v1730_v3 = vpack.c.bf16 %v136_v6, %v133_v2  ;;  %v36_v62 = vld [vmem:[%s1980_s1 + $0x70] sm:$0xff]  ;;  %v37_v52 = vld [vmem:[%s1980_s1 + $0x78] sm:$0xff] }
  0x28   :  { %1192 = vmatprep.subr.bf16.mxu1 %v1191_v51  ;;  %v2008_v32 = vand.u32 4294901760, %v1720_v13  ;;  %v2009_v29 = vand.u32 4294901760, %v1723_v23  ;;  %v1735_v12 = vsub.f32 %v1700_v45, %v91_v27  ;;  %v145_v50 = vand.u32 4294901760, %v52_v47 }
  0x29   :  { %2029 = vst [vmem:[#allocation7_spill] sm:$0xff] %v1730_v3  ;;  %v1193_v28 = vpack.c.bf16 %v248_v57, %v241_v43  ;;  %v1743_v2 = vsub.f32 %v35_v34, %v94_v41  ;;  %1160 = vmatprep.subr.bf16.mxu0 %v1730_v3  ;;  %v148_v6 = vand.u32 4294901760, %v53_v46  ;;  %v1746_v51 = vpack.c.bf16 %v88_v18, %v85_v31 }
  0x2a   :  { %v366_v45 = vsub.f32 %v1720_v13, %v2008_v32  ;;  %v373_v36 = vsub.f32 %v1723_v23, %v2009_v29  ;;  %v2018_v35 = vand.u32 4294901760, %v1735_v12  ;;  %v1755_v15 = vsub.f32 %v52_v47, %v145_v50 }
  0x2b   :  { %2030 = vst [vmem:[#allocation8_spill] sm:$0xff] %v1746_v51  ;;  %1194 = vmatpush3.bf16.msra.mxu1 %v1193_v28  ;;  %v2023_v34 = vand.u32 4294901760, %v1743_v2  ;;  %v1758_v43 = vsub.f32 %v53_v46, %v148_v6  ;;  %1162 = vmatpush3.bf16.msra.mxu0 %v1746_v51  ;;  %v97_v31 = vand.u32 4294901760, %v36_v62  ;;  %v100_v18 = vand.u32 4294901760, %v37_v52 }
  0x2c   :  { %v367_v57 = vand.u32 4294901760, %v366_v45  ;;  %v374_v3 = vand.u32 4294901760, %v373_v36  ;;  %v254_v32 = vsub.f32 %v1735_v12, %v2018_v35  ;;  %v379_v29 = vand.u32 4294901760, %v1755_v15 }
  0x2d   :  { %v261_v47 = vsub.f32 %v1743_v2, %v2023_v34  ;;  %v386_v28 = vand.u32 4294901760, %v1758_v43  ;;  %v1769_v46 = vsub.f32 %v36_v62, %v97_v31  ;;  %v1771_v11 = vsub.f32 %v37_v52, %v100_v18 }
  0x2e   :  { %v1195_v51 = vpack.c.bf16 %v374_v3, %v367_v57  ;;  %v255_v10 = vand.u32 4294901760, %v254_v32  ;;  %v380_v36 = vsub.f32 %v1755_v15, %v379_v29  ;;  %v1774_v45 = vpack.c.bf16 %v142_v42, %v139_v59 }
  0x2f   :  { %v262_v4 = vand.u32 4294901760, %v261_v47  ;;  %v387_v35 = vsub.f32 %v1758_v43, %v386_v28  ;;  %v267_v38 = vand.u32 4294901760, %v1769_v46  ;;  %v274_v55 = vand.u32 4294901760, %v1771_v11 }
  0x30   :  { %1196 = vmatprep.subr.bf16.mxu1 %v1195_v51  ;;  %v381_v34 = vand.u32 4294901760, %v380_v36  ;;  %1164 = vmatprep.subr.bf16.mxu0 %v1774_v45  ;;  %v1780_v62 = vpack.c.bf16 %v94_v41, %v91_v27  ;;  %v1782_v52 = vpack.c.bf16 %v148_v6, %v145_v50  ;;  %v1784_v3 = vpack.c.bf16 %v100_v18, %v97_v31 }
  0x31   :  { %v1197_v32 = vpack.c.bf16 %v262_v4, %v255_v10  ;;  %v388_v59 = vand.u32 4294901760, %v387_v35  ;;  %v268_v42 = vsub.f32 %v1769_v46, %v267_v38  ;;  %v275_v57 = vsub.f32 %v1771_v11, %v274_v55 }
  0x32   :  { %1166 = vmatpush3.bf16.msra.mxu0 %v1780_v62  ;;  %v1203_v51 = vpack.c.bf16 %v1398_v19, %v1390_v14  ;;  %v1211_v50 = vpack.c.bf16 %v1499_v8, %v1493_v5  ;;  %v1215_v18 = vpack.c.bf16 %v1530_v39, %v1527_v37  ;;  %v1219_v36 = vpack.c.bf16 %v1615_v60, %v1607_v54 }
  0x33   :  { %1198 = vmatpush3.bf16.msra.mxu1 %v1197_v32  ;;  %v1199_v35 = vpack.c.bf16 %v388_v59, %v381_v34  ;;  %v269_v4 = vand.u32 4294901760, %v268_v42  ;;  %v276_v10 = vand.u32 4294901760, %v275_v57  ;;  %1168 = vmatprep.subr.bf16.mxu0 %v1782_v52  ;;  %v1217_v34 = vpack.c.bf16 %v1556_v48, %v1540_v22 }
  0x34   :  { %v1221_v32 = vpack.c.bf16 %v1639_v56, %v1623_v49  ;;  %v1223_v59 = vpack.c.bf16 %v1654_v44, %v1651_v58  ;;  %v2033_v42 = vand.u32 4294901760, %v1505_v9  ;;  %v2034_v27 = vand.u32 4294901760, %v1516_v16 }
  0x35   :  { %1200 = vmatprep.subr.bf16.mxu1 %v1199_v35  ;;  %v1201_v31 = vpack.c.bf16 %v276_v10, %v269_v4  ;;  %v2031_v10 = vand.u32 4294901760, %v1493_v5  ;;  %v2036_v41 = vand.u32 4294901760, %v1615_v60  ;;  %v2037_v4 = vand.u32 4294901760, %v1623_v49 }
  0x36   :  { %1170 = vmatpush3.bf16.msra.mxu0 %v1784_v3  ;;  %v1834_v57 = vpack.c.bf16 %v2034_v27, %v2033_v42  ;;  %v2038_v5 = vand.u32 4294901760, %v1639_v56  ;;  %v2041_v27 = vand.u32 4294901760, %v1672_v33  ;;  %v2044_v60 = vand.u32 4294901760, %v1720_v13 }
  0x37   :  { %1202 = vmatpush3.bf16.msra.mxu1 %v1201_v31  ;;  %1204 = vmatprep.subr.bf16.mxu0 %v1203_v51  ;;  %v2032_v31 = vand.u32 4294901760, %v1499_v8  ;;  %v2035_v51 = vand.u32 4294901760, %v1607_v54  ;;  %v2039_v8 = vand.u32 4294901760, %v1651_v58  ;;  %v2042_v54 = vand.u32 4294901760, %v1675_v40 }
  0x38   :  { %1236 = vmatprep.subr.bf16.mxu1 %v1464_v53  ;;  %v1846_v47 = vpack.c.bf16 %v2038_v5, %v2037_v4  ;;  %v2045_v49 = vand.u32 4294901760, %v1723_v23  ;;  %v2047_v56 = vand.u32 4294901760, %v1735_v12  ;;  %v2048_v58 = vand.u32 4294901760, %v1743_v2 }
  0x39   :  { %v1828_v6 = vpack.c.bf16 %v2032_v31, %v2031_v10  ;;  %v1840_v35 = vpack.c.bf16 %v2036_v41, %v2035_v51  ;;  %v2040_v10 = vand.u32 4294901760, %v1654_v44  ;;  %v1858_v42 = vpack.c.bf16 %v2042_v54, %v2041_v27 }
  0x3a   :  { %v1864_v41 = vpack.c.bf16 %v2045_v49, %v2044_v60  ;;  %v1870_v51 = vpack.c.bf16 %v2048_v58, %v2047_v56  ;;  %v1872_v44 = vpack.c.bf16 %v386_v28, %v379_v29  ;;  %v1874_v4 = vpack.c.bf16 %v274_v55, %v267_v38 }
  0x3b   :  { %v1852_v31 = vpack.c.bf16 %v2040_v10, %v2039_v8  ;;  %2043 = vst [vmem:[#allocation9_spill] sm:$0xff] %v1858_v42 }
  0x3c   :  { %2046 = vst [vmem:[#allocation10_spill] sm:$0xff] %v1864_v41 }
  0x91   :  { %v15_v5 = vpop.xlane.xlu0 %14 }
  0x92   :  { %v16_v8 = vsub.f32 %v1358_v0, %v15_v5  ;;  %v17_v10 = vsub.f32 %v1363_v1, %v15_v5  ;;  %v2049_v5 = vpack.c.bf16 %v1402_v21, %v1400_v20 }
  0x94   :  { %v18_v27 = vmul.f32 1.442695, %v16_v8  ;;  %v20_v54 = vmul.f32 1.442695, %v17_v10  ;;  %v2050_v8 = vld [vmem:[#allocation2_spill] sm:$0xff]  ;;  %v2051_v10 = vpack.c.bf16 %v1408_v25, %v1406_v24 }
  0x96   :  { %1333 = vpow2.f32 %v18_v27  ;;  %v2052_v27 = vld [vmem:[#allocation3_spill] sm:$0xff] }
  0x97   :  { %1335 = vpow2.f32 %v20_v54  ;;  %v2053_v54 = vpack.c.bf16 %v1419_v30, %v1413_v26 }
  0xa0   :  { %v1334_v60 = vpop.eup %1333 }
  0xa1   :  { %v1336_v49 = vpop.eup %1335  ;;  %v1878_v41 = vand.u32 4294901760, %v1334_v60 }
  0xa2   :  { %v150_v42 = vand.u32 4294901760, %v1336_v49 }
  0xa3   :  { %v157_v56 = vsub.f32 %v1334_v60, %v1878_v41  ;;  %v2054_v60 = vld [vmem:[#allocation4_spill] sm:$0xff] }
  0xa4   :  { %391 = vmatprep.mubr.f32.mxu1 %v150_v42  ;;  %v151_v29 = vsub.f32 %v1336_v49, %v150_v42  ;;  %v2055_v49 = vld [vmem:[#allocation5_spill] sm:$0xff] }
  0xa5   :  { %393 = vmatmul.mubr.f32.vlgmr.msra.gmra.mrb[0].mxu1 %v1878_v41  ;;  %v158_v38 = vand.u32 4294901760, %v157_v56 }
  0xa6   :  { %1238 = vmatpush3.bf16.msra.mxu1 %v1484_v63  ;;  %v152_v0 = vand.u32 4294901760, %v151_v29 }
  0xa7   :  { %1240 = vmatprep.subr.bf16.mxu1 %v1496_v7  ;;  %v159_v1 = vsub.f32 %v157_v56, %v158_v38 }
  0xa8   :  { %635 = vmatprep.mubr.f32.mxu1 %v152_v0  ;;  %v153_v55 = vsub.f32 %v151_v29, %v152_v0  ;;  %v2056_v0 = vpack.c.bf16 %v1516_v16, %v1505_v9  ;;  %v2060_v9 = vpack.c.bf16 %v1675_v40, %v1672_v33  ;;  %v2061_v16 = vpack.c.bf16 %v1723_v23, %v1720_v13 }
  0xa9   :  { %v160_v28 = vand.u32 4294901760, %v159_v1  ;;  %v2058_v1 = vld [vmem:[#allocation7_spill] sm:$0xff]  ;;  %v2063_v33 = vpack.c.bf16 %v1758_v43, %v1755_v15  ;;  %v2064_v40 = vand.u32 4294901760, %v1390_v14  ;;  %v2068_v23 = vand.u32 4294901760, %v1402_v21 }
  0xaa   :  { %1242 = vmatpush3.bf16.msra.mxu1 %v1521_v17  ;;  %v154_v58 = vand.u32 4294901760, %v153_v55  ;;  %v2059_v55 = vld [vmem:[#allocation8_spill] sm:$0xff]  ;;  %v2069_v14 = vand.u32 4294901760, %v1406_v24  ;;  %v2074_v21 = vand.u32 4294901760, %v1530_v39  ;;  %v2078_v39 = vld [vmem:[#allocation10_spill] sm:$0xff] }
  0xab   :  { %1244 = vmatprep.subr.bf16.mxu1 %v1578_v61 }
  0xac   :  { %155 = vmatprep.mubr.f32.mxu0 %v154_v58 }
  0xad   :  { %161 = vmatmul.mubr.f32.vlgmr.msra.gmra.mrb[0].mxu0 %v160_v28 }
  0xae   :  { %1206 = vmatpush3.bf16.msra.mxu0 %v2049_v5  ;;  %1246 = vmatpush3.bf16.msra.mxu1 %v2050_v8 }
  0xaf   :  { %528 = vmatprep.mubr.f32.mxu0 %v151_v29  ;;  %1208 = vmatprep.subr.bf16.mxu0 %v2051_v10  ;;  %v2057_v29 = vld [vmem:[#allocation6_spill] sm:$0xff] }
  0xb0   :  { %1248 = vmatprep.subr.bf16.mxu1 %v2052_v27 }
  0xb2   :  { %1210 = vmatpush3.bf16.msra.mxu0 %v2053_v54  ;;  %1250 = vmatpush3.bf16.msra.mxu1 %v2054_v60 }
  0xb3   :  { %1212 = vmatprep.subr.bf16.mxu0 %v1211_v50  ;;  %1252 = vmatprep.subr.bf16.mxu1 %v2055_v49  ;;  %v2062_v50 = vpack.c.bf16 %v1743_v2, %v1735_v12 }
  0xb6   :  { %1214 = vmatpush3.bf16.msra.mxu0 %v2056_v0  ;;  %1254 = vmatpush3.bf16.msra.mxu1 %v2057_v29 }
  0xb7   :  { %1216 = vmatprep.subr.bf16.mxu0 %v1215_v18  ;;  %1256 = vmatprep.subr.bf16.mxu1 %v2058_v1  ;;  %v2065_v18 = vand.u32 4294901760, %v1398_v19  ;;  %v2070_v19 = vand.u32 4294901760, %v1408_v25  ;;  %v2075_v25 = vand.u32 4294901760, %v1540_v22  ;;  %v1339_v22 = vmov 2  }
  0xb8   :  { %1332 = vset.pattern.permute.xlu0 %v1339_v22 }
  0xb9   :  { %v1267_v13 = vpack.c.bf16 %v2065_v18, %v2064_v40  ;;  %v1271_v15 = vpack.c.bf16 %v2070_v19, %v2069_v14 }
  0xba   :  { %1218 = vmatpush3.bf16.msra.mxu0 %v1217_v34  ;;  %1258 = vmatpush3.bf16.msra.mxu1 %v2059_v55 }
  0xbb   :  { %1220 = vmatprep.subr.bf16.mxu0 %v1219_v36  ;;  %1260 = vmatprep.subr.bf16.mxu1 %v1774_v45 }
  0xbe   :  { %1222 = vmatpush3.bf16.msra.mxu0 %v1221_v32  ;;  %1262 = vmatpush3.bf16.msra.mxu1 %v1780_v62 }
  0xbf   :  { %1224 = vmatprep.subr.bf16.mxu0 %v1223_v59  ;;  %1264 = vmatprep.subr.bf16.mxu1 %v1782_v52 }
  0xc2   :  { %1226 = vmatpush3.bf16.msra.mxu0 %v2060_v9  ;;  %1266 = vmatpush3.bf16.msra.mxu1 %v1784_v3 }
  0xc3   :  { %1228 = vmatprep.subr.bf16.mxu0 %v2061_v16  ;;  %1300 = vmatprep.subr.bf16.mxu1 %v1464_v53  ;;  %v2066_v53 = vpack.c.bf16 %v1771_v11, %v1769_v46 }
  0xc5   :  { %639 = vmatmul.mubr.f32.vlgmr.msra.gmra.mrb[2].mxu1 %v158_v38 }
  0xc6   :  { %1230 = vmatpush3.bf16.msra.mxu0 %v2062_v50  ;;  %1302 = vmatpush3.bf16.msra.mxu1 %v1484_v63  ;;  %v2067_v63 = vand.u32 4294901760, %v1400_v20  ;;  %v2073_v20 = vand.u32 4294901760, %v1527_v37  ;;  %v2077_v37 = vld [vmem:[#allocation9_spill] sm:$0xff] }
  0xc7   :  { %909 = vmatprep.mubr.f32.mxu1 %v150_v42  ;;  %1232 = vmatprep.subr.bf16.mxu0 %v2063_v33 }
  0xc8   :  { %1304 = vmatprep.subr.bf16.mxu1 %v1496_v7  ;;  %v1269_v12 = vpack.c.bf16 %v2068_v23, %v2067_v63  ;;  %v2071_v7 = vand.u32 4294901760, %v1413_v26  ;;  %v1279_v24 = vpack.c.bf16 %v2074_v21, %v2073_v20  ;;  %v2076_v26 = vand.u32 4294901760, %v1556_v48 }
  0xca   :  { %1234 = vmatpush3.bf16.msra.mxu0 %v2066_v53  ;;  %1306 = vmatpush3.bf16.msra.mxu1 %v1521_v17  ;;  %v2072_v17 = vand.u32 4294901760, %v1419_v30  ;;  %v1281_v30 = vpack.c.bf16 %v2076_v26, %v2075_v25 }
  0xcb   :  { %1268 = vmatprep.subr.bf16.mxu0 %v1267_v13  ;;  %1308 = vmatprep.subr.bf16.mxu1 %v1578_v61 }
  0xcc   :  { %v1273_v11 = vpack.c.bf16 %v2072_v17, %v2071_v7 }
  0xcd   :  { %531 = vmatmul.mubr.f32.vlgmr.msra.gmra.mrb[2].mxu0 %v157_v56 }
  0xce   :  { %1270 = vmatpush3.bf16.msra.mxu0 %v1269_v12  ;;  %805 = vmatprep.mubr.f32.mxu0 %v150_v42 }
  0xcf   :  { %1310 = vmatpush3.bf16.msra.mxu1 %v2050_v8  ;;  %1272 = vmatprep.subr.bf16.mxu0 %v1271_v15 }
  0xd0   :  { %1312 = vmatprep.subr.bf16.mxu1 %v2052_v27 }
  0xd2   :  { %1274 = vmatpush3.bf16.msra.mxu0 %v1273_v11 }
  0xd3   :  { %1314 = vmatpush3.bf16.msra.mxu1 %v2054_v60  ;;  %1276 = vmatprep.subr.bf16.mxu0 %v1828_v6 }
  0xd4   :  { %1316 = vmatprep.subr.bf16.mxu1 %v2055_v49 }
  0xd6   :  { %1278 = vmatpush3.bf16.msra.mxu0 %v1834_v57 }
  0xd7   :  { %1318 = vmatpush3.bf16.msra.mxu1 %v2057_v29  ;;  %1280 = vmatprep.subr.bf16.mxu0 %v1279_v24 }
  0xd8   :  { %1320 = vmatprep.subr.bf16.mxu1 %v2058_v1 }
  0xda   :  { %1282 = vmatpush3.bf16.msra.mxu0 %v1281_v30 }
  0xdb   :  { %1322 = vmatpush3.bf16.msra.mxu1 %v2059_v55  ;;  %1284 = vmatprep.subr.bf16.mxu0 %v1840_v35 }
  0xdc   :  { %1324 = vmatprep.subr.bf16.mxu1 %v1774_v45 }
  0xde   :  { %1286 = vmatpush3.bf16.msra.mxu0 %v1846_v47 }
  0xdf   :  { %1326 = vmatpush3.bf16.msra.mxu1 %v1780_v62  ;;  %1288 = vmatprep.subr.bf16.mxu0 %v1852_v31 }
  0xe0   :  { %1328 = vmatprep.subr.bf16.mxu1 %v1782_v52 }
  0xe2   :  { %1290 = vmatpush3.bf16.msra.mxu0 %v2077_v37 }
  0xe3   :  { %1330 = vmatpush3.bf16.msra.mxu1 %v1784_v3  ;;  %1292 = vmatprep.subr.bf16.mxu0 %v2078_v39 }
  0xe6   :  { %911 = vmatmul.mubr.f32.vlgmr.msra.gmra.mrb[4].mxu1 %v1878_v41  ;;  %1294 = vmatpush3.bf16.msra.mxu0 %v1870_v51 }
  0xe7   :  { %1296 = vmatprep.subr.bf16.mxu0 %v1872_v44 }
  0xea   :  { %1298 = vmatpush3.bf16.msra.mxu0 %v1874_v4 }
  0xed   :  { %807 = vmatmul.mubr.f32.vlgmr.msra.gmra.mrb[4].mxu0 %v1878_v41 }
 0x178   :  { %v996_v48 = vpop.f32.mrb[0].mxu1 }
 0x179   :  { %v997_v61 = vpop.f32.mrb[1].mxu1 }
 0x17a   :  { %v998_v2 = vadd.f32 %v997_v61, %v996_v48 }
 0x180   :  { %v961_v43 = vpop.f32.mrb[0].mxu0 }
 0x181   :  { %v962_v46 = vpop.f32.mrb[1].mxu0 }
 0x182   :  { %v963_v45 = vadd.f32 %v962_v46, %v961_v43 }
 0x184   :  { %v395_v62 = vadd.f32 %v998_v2, %v963_v45 }
 0x198   :  { %v1066_v52 = vpop.f32.mrb[2].mxu1 }
 0x199   :  { %v1067_v3 = vpop.f32.mrb[3].mxu1 }
 0x19a   :  { %v1068_v47 = vadd.f32 %v1067_v3, %v1066_v52 }
 0x1a0   :  { %v1031_v6 = vpop.f32.mrb[2].mxu0 }
 0x1a1   :  { %v1032_v34 = vpop.f32.mrb[3].mxu0 }
 0x1a2   :  { %v1033_v36 = vadd.f32 %v1032_v34, %v1031_v6 }
 0x1a4   :  { %v533_v32 = vadd.f32 %v1033_v36, %v395_v62 }
 0x1a6   :  { %v641_v59 = vadd.f32 %v1068_v47, %v533_v32 }
 0x1b9   :  { %v1136_v57 = vpop.f32.mrb[4].mxu1 }
 0x1ba   :  { %v1137_v35 = vpop.f32.mrb[5].mxu1 }
 0x1bb   :  { %v1138_v31 = vadd.f32 %v1137_v35, %v1136_v57 }
 0x1c0   :  { %v1101_v42 = vpop.f32.mrb[4].mxu0 }
 0x1c1   :  { %v1102_v41 = vpop.f32.mrb[5].mxu0 }
 0x1c2   :  { %v1103_v51 = vadd.f32 %v1102_v41, %v1101_v42 }
 0x1c4   :  { %v809_v44 = vadd.f32 %v1103_v51, %v641_v59 }
 0x1c6   :  { %v913_v4 = vadd.f32 %v1138_v31, %v809_v44 }
 0x1c8   :  { %1337 = vrcp.f32 %v913_v4 }
 0x1d2   :  { %v1338_v56 = vpop.eup %1337 }
 0x1d3   :  { %919 = vperm.xlu0 %1332, %v1338_v56  }
 0x252   :  { %v920_v38 = vpop.permute.xlu0 %919 }
 0x253   :  { %v922_v28 = vmul.f32 %v920_v38, %v913_v4 }
 0x255   :  { %924 = vst.msk [vmem:[%s1981_s2] sm:$0xff] %vm923_vm0, %v922_v28 }

</bundles_post_ra>
